<compile_context>
chip_gen: v6e
topology: v6e:2x2x1
jax: 0.10.0
libtpu: 0.0.40
codegen_flags: <defaults>
</compile_context>

<pallas_src>
import jax
import jax.numpy as jnp
from jax.experimental import pallas as pl
from jax.experimental.pallas import tpu as pltpu

# Small, module-consistent sizes.
VOCAB_SIZE = 50
EMBED_DIM = 32
NUM_FILTERS = 32
KERNEL_SIZES = (3, 4, 5)
NUM_CLASSES = 2
SEQ_LEN = 16
BATCH = 2


# ---------------------------------------------------------------------------
# Fused single-program kernel: lane-stacked conv bank + relu + max-pool + fc
# ---------------------------------------------------------------------------
def _make_textcnn_kernel(batch, seq_len, kernel_sizes, num_filters):
    k_max = max(kernel_sizes)
    nf_tot = num_filters * len(kernel_sizes)
    m_out = batch * seq_len                     # batch folded into matmul M

    def kernel(x_ref, w_ref, cb_ref, fcwt_ref, fcb_ref, out_ref):
        # x_ref   : (B*T + k_max-1, E)  flattened, zero-padded embeddings
        # w_ref   : (k_max, E, 3F)      lane-stacked per-tap conv weights
        # cb_ref  : (1, 3F)             packed conv biases
        # fcwt_ref: (3F, C)             fc.weight^T
        # fcb_ref : (1, C)
        # out_ref : (B, C)

        # Conv bank: k_max static-tap MXU matmuls at full (B*T) sublane fill
        # and 96-lane fill.  Zero-padded taps contribute exactly 0.
        acc = jnp.dot(x_ref[0:m_out, :], w_ref[0],
                      preferred_element_type=jnp.float32)
        for j in range(1, k_max):
            acc = acc + jnp.dot(x_ref[j:j + m_out, :], w_ref[j],
                                preferred_element_type=jnp.float32)   # (B*T,3F)

        # Compile-time-constant validity mask: lane group ci (kernel size k_ci)
        # only has valid conv outputs for t <= T - k_ci.  Positions beyond that
        # hold partial sums (zero-padded taps / next example rows) and MUST be
        # masked to -inf before the time max.
        t_idx = jax.lax.broadcasted_iota(jnp.int32, (seq_len, nf_tot), 0)
        lane = jax.lax.broadcasted_iota(jnp.int32, (seq_len, nf_tot), 1)
        tlim = jnp.full((seq_len, nf_tot), seq_len - kernel_sizes[0], jnp.int32)
        for ci, k in enumerate(kernel_sizes):
            grp = (lane >= ci * num_filters) & (lane < (ci + 1) * num_filters)
            tlim = jnp.where(grp, seq_len - k, tlim)
        valid = t_idx <= tlim                                    # (T, 3F)

        # Per-example max over time (rows b*T : (b+1)*T are sublane-aligned).
        pooled_rows = []
        for b in range(batch):
            blk = acc[b * seq_len:(b + 1) * seq_len, :]          # (T, 3F)
            blk = jnp.where(valid, blk, -jnp.inf)
            pooled_rows.append(jnp.max(blk, axis=0, keepdims=True))
        pooled = jnp.concatenate(pooled_rows, axis=0)            # (B, 3F)

        # F.relu_ + max_pool1d fusion: max_t relu(conv_t + b) == relu(max_t + b)
        feat = jnp.maximum(pooled + cb_ref[...], 0.0)            # (B, 3F)

        # fc: one lane-contiguous matmul + single (B, C) store.
        out_ref[...] = (jnp.dot(feat, fcwt_ref[...],
                                preferred_element_type=jnp.float32)
                        + fcb_ref[...])

    return kernel


def textcnn_forward(input_ids, params):
    # nn.Embedding lookup + .float(): one gather in the wrapper; it fuses with
    # the pad/reshape below into a single XLA op feeding the Pallas call.
    x = jnp.take(params["embedding"], input_ids, axis=0).astype(jnp.float32)
    B, T, E = x.shape
    k_max = max(KERNEL_SIZES)
    C = params["fc_b"].shape[1]

    # Fold batch into the matmul M dimension; k_max-1 trailing zero rows keep
    # every static tap slice in bounds (cross-example reads only ever hit
    # zero-weight taps or masked time positions).
    x_flat = jnp.pad(x.reshape(B * T, E), ((0, k_max - 1), (0, 0)))

    w = params["conv_w"]          # (k_max, E, 3F)
    cb = params["conv_b"]         # (1, 3F)
    fcwt = params["fc_w_t"]       # (3F, C)
    fcb = params["fc_b"]          # (1, C)

    kernel = _make_textcnn_kernel(B, T, KERNEL_SIZES, NUM_FILTERS)

    out = pl.pallas_call(
        kernel,
        out_shape=jax.ShapeDtypeStruct((B, C), jnp.float32),
        grid=(1,),
        in_specs=[
            pl.BlockSpec(x_flat.shape, lambda i: (0, 0)),
            pl.BlockSpec(w.shape, lambda i: (0, 0, 0)),
            pl.BlockSpec(cb.shape, lambda i: (0, 0)),
            pl.BlockSpec(fcwt.shape, lambda i: (0, 0)),
            pl.BlockSpec(fcb.shape, lambda i: (0, 0)),
        ],
        out_specs=pl.BlockSpec((B, C), lambda i: (0, 0)),
        compiler_params=pltpu.CompilerParams(
            dimension_semantics=("arbitrary",)),
    )(x_flat, w, cb, fcwt, fcb)
    return out                                              # (B, C)


# ---------------------------------------------------------------------------
# Deterministic parameter init (PyTorch layouts kept for the reference path)
# ---------------------------------------------------------------------------
def init_params(key):
    keys = iter(jax.random.split(key, 16))

    def u(shape, scale=0.1):
        return jax.random.uniform(next(keys), shape, jnp.float32, -scale, scale)

    emb = u((VOCAB_SIZE, EMBED_DIM), 0.5)

    k_max = max(KERNEL_SIZES)
    nf_tot = NUM_FILTERS * len(KERNEL_SIZES)

    convs_torch = []   # PyTorch layout: weight (F, E, k), bias (F,)
    w_packed = jnp.zeros((k_max, EMBED_DIM, nf_tot), jnp.float32)
    b_packed = jnp.zeros((1, nf_tot), jnp.float32)
    for ci, k in enumerate(KERNEL_SIZES):
        w = u((NUM_FILTERS, EMBED_DIM, k))
        b = u((NUM_FILTERS,))
        convs_torch.append((w, b))
        # Per-tap transposed (k, E, F), lane-stacked into group ci and
        # zero-padded to k_max taps.
        w_packed = w_packed.at[:k, :, ci * NUM_FILTERS:(ci + 1) * NUM_FILTERS].set(
            jnp.transpose(w, (2, 1, 0)))
        b_packed = b_packed.at[0, ci * NUM_FILTERS:(ci + 1) * NUM_FILTERS].set(b)

    fc_w = u((NUM_CLASSES, nf_tot))
    fc_b = u((NUM_CLASSES,))

    return {
        "embedding": emb,
        "convs_torch": convs_torch,
        "conv_w": w_packed,
        "conv_b": b_packed,
        "fc_w": fc_w,
        "fc_w_t": fc_w.T,
        "fc_b": fc_b[None, :],
    }


# ---------------------------------------------------------------------------
# Pure-JAX reference (independent path through lax.conv) for a sanity check
# ---------------------------------------------------------------------------
def ref_forward(input_ids, params):
    x = jnp.take(params["embedding"], input_ids, axis=0).astype(jnp.float32)
    xr = jnp.transpose(x, (0, 2, 1))                          # (B, E, T)
    feats = []
    for w, b in params["convs_torch"]:
        conv = jax.lax.conv_general_dilated(
            xr, w, window_strides=(1,), padding="VALID",
            dimension_numbers=("NCH", "OIH", "NCH"))          # (B, F, Tout)
        conv = jax.nn.relu(conv + b[None, :, None])
        feats.append(jnp.max(conv, axis=2))                   # (B, F)
    feat = jnp.concatenate(feats, axis=1)                     # (B, 3F)
    return feat @ params["fc_w"].T + params["fc_b"]


if __name__ == "__main__":
    key = jax.random.PRNGKey(0)
    pkey, dkey = jax.random.split(key)
    params = init_params(pkey)

    input_ids = jax.random.randint(dkey, (BATCH, SEQ_LEN), 0, VOCAB_SIZE)

    fwd = jax.jit(textcnn_forward)
    out = jax.block_until_ready(fwd(input_ids, params))

    ref = ref_forward(input_ids, params)
    assert out.shape == (BATCH, NUM_CLASSES), out.shape
    assert jnp.allclose(out, ref, atol=1e-3, rtol=1e-3), (out, ref)
    print("KERNEL_OK")
</pallas_src>

<mosaic_0001>
module attributes {stable_mosaic.version = 11 : i64} {
  func.func @kernel(%arg0: i32, %arg1: memref<36x32xf32, #tpu.memory_space<vmem>>, %arg2: memref<5x32x96xf32, #tpu.memory_space<vmem>>, %arg3: memref<1x96xf32, #tpu.memory_space<vmem>>, %arg4: memref<96x2xf32, #tpu.memory_space<vmem>>, %arg5: memref<1x2xf32, #tpu.memory_space<vmem>>, %arg6: memref<2x2xf32, #tpu.memory_space<vmem>>) attributes {dimension_semantics = [#tpu.dimension_semantics<arbitrary>], iteration_bounds = array<i64: 1>, scalar_prefetch = 0 : i64, scratch_operands = 0 : i64, tpu.core_type = #tpu.core_type<tc>, window_params = [{pipeline_mode = #tpu.pipeline_mode<synchronous>, transform_indices = @transform_0, window_bounds = array<i64: 36, 32>}, {pipeline_mode = #tpu.pipeline_mode<synchronous>, transform_indices = @transform_1, window_bounds = array<i64: 5, 32, 96>}, {pipeline_mode = #tpu.pipeline_mode<synchronous>, transform_indices = @transform_2, window_bounds = array<i64: 1, 96>}, {pipeline_mode = #tpu.pipeline_mode<synchronous>, transform_indices = @transform_3, window_bounds = array<i64: 96, 2>}, {pipeline_mode = #tpu.pipeline_mode<synchronous>, transform_indices = @transform_4, window_bounds = array<i64: 1, 2>}, {pipeline_mode = #tpu.pipeline_mode<synchronous>, transform_indices = @transform_5, window_bounds = array<i64: 2, 2>}]} {
    %c0 = arith.constant 0 : index
    %c0_0 = arith.constant 0 : index
    %0 = vector.load %arg1[%c0, %c0_0] : memref<36x32xf32, #tpu.memory_space<vmem>>, vector<32x32xf32>
    %c0_1 = arith.constant 0 : index
    %c0_2 = arith.constant 0 : index
    %c0_3 = arith.constant 0 : index
    %1 = vector.load %arg2[%c0_1, %c0_2, %c0_3] : memref<5x32x96xf32, #tpu.memory_space<vmem>>, vector<1x32x96xf32>
    %2 = vector.shape_cast %1 : vector<1x32x96xf32> to vector<32x96xf32>
    %cst = arith.constant dense<0.000000e+00> : vector<32x96xf32>
    %3 = tpu.matmul %0, %2, %cst {dimension_numbers = #tpu.dot_dimension_numbers<[1], [0], [0], [1], [0, 0, 1, 1], [], []>} : vector<32x32xf32>, vector<32x96xf32>, vector<32x96xf32> -> vector<32x96xf32>
    %c1 = arith.constant 1 : index
    %c0_4 = arith.constant 0 : index
    %4 = vector.load %arg1[%c1, %c0_4] : memref<36x32xf32, #tpu.memory_space<vmem>>, vector<32x32xf32>
    %c1_5 = arith.constant 1 : index
    %c0_6 = arith.constant 0 : index
    %c0_7 = arith.constant 0 : index
    %5 = vector.load %arg2[%c1_5, %c0_6, %c0_7] : memref<5x32x96xf32, #tpu.memory_space<vmem>>, vector<1x32x96xf32>
    %6 = vector.shape_cast %5 : vector<1x32x96xf32> to vector<32x96xf32>
    %cst_8 = arith.constant dense<0.000000e+00> : vector<32x96xf32>
    %7 = tpu.matmul %4, %6, %cst_8 {dimension_numbers = #tpu.dot_dimension_numbers<[1], [0], [0], [1], [0, 0, 1, 1], [], []>} : vector<32x32xf32>, vector<32x96xf32>, vector<32x96xf32> -> vector<32x96xf32>
    %8 = arith.addf %3, %7 : vector<32x96xf32>
    %c2 = arith.constant 2 : index
    %c0_9 = arith.constant 0 : index
    %9 = vector.load %arg1[%c2, %c0_9] : memref<36x32xf32, #tpu.memory_space<vmem>>, vector<32x32xf32>
    %c2_10 = arith.constant 2 : index
    %c0_11 = arith.constant 0 : index
    %c0_12 = arith.constant 0 : index
    %10 = vector.load %arg2[%c2_10, %c0_11, %c0_12] : memref<5x32x96xf32, #tpu.memory_space<vmem>>, vector<1x32x96xf32>
    %11 = vector.shape_cast %10 : vector<1x32x96xf32> to vector<32x96xf32>
    %cst_13 = arith.constant dense<0.000000e+00> : vector<32x96xf32>
    %12 = tpu.matmul %9, %11, %cst_13 {dimension_numbers = #tpu.dot_dimension_numbers<[1], [0], [0], [1], [0, 0, 1, 1], [], []>} : vector<32x32xf32>, vector<32x96xf32>, vector<32x96xf32> -> vector<32x96xf32>
    %13 = arith.addf %8, %12 : vector<32x96xf32>
    %c3 = arith.constant 3 : index
    %c0_14 = arith.constant 0 : index
    %14 = vector.load %arg1[%c3, %c0_14] : memref<36x32xf32, #tpu.memory_space<vmem>>, vector<32x32xf32>
    %c3_15 = arith.constant 3 : index
    %c0_16 = arith.constant 0 : index
    %c0_17 = arith.constant 0 : index
    %15 = vector.load %arg2[%c3_15, %c0_16, %c0_17] : memref<5x32x96xf32, #tpu.memory_space<vmem>>, vector<1x32x96xf32>
    %16 = vector.shape_cast %15 : vector<1x32x96xf32> to vector<32x96xf32>
    %cst_18 = arith.constant dense<0.000000e+00> : vector<32x96xf32>
    %17 = tpu.matmul %14, %16, %cst_18 {dimension_numbers = #tpu.dot_dimension_numbers<[1], [0], [0], [1], [0, 0, 1, 1], [], []>} : vector<32x32xf32>, vector<32x96xf32>, vector<32x96xf32> -> vector<32x96xf32>
    %18 = arith.addf %13, %17 : vector<32x96xf32>
    %c4 = arith.constant 4 : index
    %c0_19 = arith.constant 0 : index
    %19 = vector.load %arg1[%c4, %c0_19] : memref<36x32xf32, #tpu.memory_space<vmem>>, vector<32x32xf32>
    %c4_20 = arith.constant 4 : index
    %c0_21 = arith.constant 0 : index
    %c0_22 = arith.constant 0 : index
    %20 = vector.load %arg2[%c4_20, %c0_21, %c0_22] : memref<5x32x96xf32, #tpu.memory_space<vmem>>, vector<1x32x96xf32>
    %21 = vector.shape_cast %20 : vector<1x32x96xf32> to vector<32x96xf32>
    %cst_23 = arith.constant dense<0.000000e+00> : vector<32x96xf32>
    %22 = tpu.matmul %19, %21, %cst_23 {dimension_numbers = #tpu.dot_dimension_numbers<[1], [0], [0], [1], [0, 0, 1, 1], [], []>} : vector<32x32xf32>, vector<32x96xf32>, vector<32x96xf32> -> vector<32x96xf32>
    %23 = arith.addf %18, %22 : vector<32x96xf32>
    %24 = tpu.iota {dimensions = array<i32: 0>} : vector<16x96xi32>
    %25 = tpu.iota {dimensions = array<i32: 1>} : vector<16x96xi32>
    %c13_i32 = arith.constant 13 : i32
    %26 = vector.broadcast %c13_i32 : i32 to vector<16x96xi32>
    %c0_i32 = arith.constant 0 : i32
    %27 = vector.broadcast %c0_i32 : i32 to vector<16x96xi32>
    %28 = arith.cmpi sge, %25, %27 : vector<16x96xi32>
    %c32_i32 = arith.constant 32 : i32
    %29 = vector.broadcast %c32_i32 : i32 to vector<16x96xi32>
    %30 = arith.cmpi slt, %25, %29 : vector<16x96xi32>
    %31 = arith.andi %28, %30 : vector<16x96xi1>
    %c13_i32_24 = arith.constant 13 : i32
    %32 = vector.broadcast %c13_i32_24 : i32 to vector<16x96xi32>
    %33 = arith.select %31, %32, %26 : vector<16x96xi1>, vector<16x96xi32>
    %c32_i32_25 = arith.constant 32 : i32
    %34 = vector.broadcast %c32_i32_25 : i32 to vector<16x96xi32>
    %35 = arith.cmpi sge, %25, %34 : vector<16x96xi32>
    %c64_i32 = arith.constant 64 : i32
    %36 = vector.broadcast %c64_i32 : i32 to vector<16x96xi32>
    %37 = arith.cmpi slt, %25, %36 : vector<16x96xi32>
    %38 = arith.andi %35, %37 : vector<16x96xi1>
    %c12_i32 = arith.constant 12 : i32
    %39 = vector.broadcast %c12_i32 : i32 to vector<16x96xi32>
    %40 = arith.select %38, %39, %33 : vector<16x96xi1>, vector<16x96xi32>
    %c64_i32_26 = arith.constant 64 : i32
    %41 = vector.broadcast %c64_i32_26 : i32 to vector<16x96xi32>
    %42 = arith.cmpi sge, %25, %41 : vector<16x96xi32>
    %c96_i32 = arith.constant 96 : i32
    %43 = vector.broadcast %c96_i32 : i32 to vector<16x96xi32>
    %44 = arith.cmpi slt, %25, %43 : vector<16x96xi32>
    %45 = arith.andi %42, %44 : vector<16x96xi1>
    %c11_i32 = arith.constant 11 : i32
    %46 = vector.broadcast %c11_i32 : i32 to vector<16x96xi32>
    %47 = arith.select %45, %46, %40 : vector<16x96xi1>, vector<16x96xi32>
    %48 = arith.cmpi sle, %24, %47 : vector<16x96xi32>
    %49 = vector.extract_strided_slice %23 {offsets = [0, 0], sizes = [16, 96], strides = [1, 1]} : vector<32x96xf32> to vector<16x96xf32>
    %cst_27 = arith.constant 0xFF800000 : f32
    %50 = vector.broadcast %cst_27 : f32 to vector<16x96xf32>
    %51 = arith.select %48, %49, %50 : vector<16x96xi1>, vector<16x96xf32>
    %cst_28 = arith.constant dense<0xFF800000> : vector<96xf32>
    %52 = vector.multi_reduction <maximumf>, %51, %cst_28 [0] : vector<16x96xf32> to vector<96xf32>
    %53 = vector.shape_cast %52 : vector<96xf32> to vector<1x96xf32>
    %54 = vector.extract_strided_slice %23 {offsets = [16, 0], sizes = [16, 96], strides = [1, 1]} : vector<32x96xf32> to vector<16x96xf32>
    %cst_29 = arith.constant 0xFF800000 : f32
    %55 = vector.broadcast %cst_29 : f32 to vector<16x96xf32>
    %56 = arith.select %48, %54, %55 : vector<16x96xi1>, vector<16x96xf32>
    %cst_30 = arith.constant dense<0xFF800000> : vector<96xf32>
    %57 = vector.multi_reduction <maximumf>, %56, %cst_30 [0] : vector<16x96xf32> to vector<96xf32>
    %58 = vector.shape_cast %57 : vector<96xf32> to vector<1x96xf32>
    %59 = tpu.concatenate %53, %58 in 0 : vector<1x96xf32>, vector<1x96xf32> -> vector<2x96xf32>
    %c0_31 = arith.constant 0 : index
    %c0_32 = arith.constant 0 : index
    %60 = vector.load %arg3[%c0_31, %c0_32] : memref<1x96xf32, #tpu.memory_space<vmem>>, vector<1x96xf32>
    %61 = vector.broadcast %60 : vector<1x96xf32> to vector<2x96xf32>
    %62 = arith.addf %59, %61 : vector<2x96xf32>
    %cst_33 = arith.constant 0.000000e+00 : f32
    %63 = vector.broadcast %cst_33 : f32 to vector<2x96xf32>
    %64 = arith.maximumf %62, %63 : vector<2x96xf32>
    %c0_34 = arith.constant 0 : index
    %c0_35 = arith.constant 0 : index
    %65 = vector.load %arg4[%c0_34, %c0_35] : memref<96x2xf32, #tpu.memory_space<vmem>>, vector<96x2xf32>
    %cst_36 = arith.constant dense<0.000000e+00> : vector<2x2xf32>
    %66 = tpu.matmul %64, %65, %cst_36 {dimension_numbers = #tpu.dot_dimension_numbers<[1], [0], [0], [1], [0, 0, 1, 1], [], []>} : vector<2x96xf32>, vector<96x2xf32>, vector<2x2xf32> -> vector<2x2xf32>
    %c0_37 = arith.constant 0 : index
    %c0_38 = arith.constant 0 : index
    %67 = vector.load %arg5[%c0_37, %c0_38] : memref<1x2xf32, #tpu.memory_space<vmem>>, vector<1x2xf32>
    %68 = vector.broadcast %67 : vector<1x2xf32> to vector<2x2xf32>
    %69 = arith.addf %66, %68 : vector<2x2xf32>
    %c0_39 = arith.constant 0 : index
    %c0_40 = arith.constant 0 : index
    %70 = vector.load %arg6[%c0_39, %c0_40] : memref<2x2xf32, #tpu.memory_space<vmem>>, vector<2x2xf32>
    tpu.vector_store %arg6[%c0_39, %c0_40], %69 {strides = array<i32>} : memref<2x2xf32, #tpu.memory_space<vmem>>, vector<2x2xf32>,
    return
  }
  func.func @transform_0(%arg0: i32) -> (i32, i32) {
    %c0_i32 = arith.constant 0 : i32
    %c0_i32_0 = arith.constant 0 : i32
    %c0_i32_1 = arith.constant 0 : i32
    return %c0_i32, %c0_i32_0 : i32, i32
  }
  func.func @transform_1(%arg0: i32) -> (i32, i32, i32) {
    %c0_i32 = arith.constant 0 : i32
    %c0_i32_0 = arith.constant 0 : i32
    %c0_i32_1 = arith.constant 0 : i32
    %c0_i32_2 = arith.constant 0 : i32
    return %c0_i32, %c0_i32_0, %c0_i32_1 : i32, i32, i32
  }
  func.func @transform_2(%arg0: i32) -> (i32, i32) {
    %c0_i32 = arith.constant 0 : i32
    %c0_i32_0 = arith.constant 0 : i32
    %c0_i32_1 = arith.constant 0 : i32
    return %c0_i32, %c0_i32_0 : i32, i32
  }
  func.func @transform_3(%arg0: i32) -> (i32, i32) {
    %c0_i32 = arith.constant 0 : i32
    %c0_i32_0 = arith.constant 0 : i32
    %c0_i32_1 = arith.constant 0 : i32
    return %c0_i32, %c0_i32_0 : i32, i32
  }
  func.func @transform_4(%arg0: i32) -> (i32, i32) {
    %c0_i32 = arith.constant 0 : i32
    %c0_i32_0 = arith.constant 0 : i32
    %c0_i32_1 = arith.constant 0 : i32
    return %c0_i32, %c0_i32_0 : i32, i32
  }
  func.func @transform_5(%arg0: i32) -> (i32, i32) {
    %c0_i32 = arith.constant 0 : i32
    %c0_i32_0 = arith.constant 0 : i32
    %c0_i32_1 = arith.constant 0 : i32
    return %c0_i32, %c0_i32_0 : i32, i32
  }
}

</mosaic_0001>

<bundles_post_ra>
// kernel: textcnn_forward.1
= control target key start
LH: loop header
LB: loop body
LE: loop exit
PB: predicated region body
PF: predicated region fallthrough
CT: control target
= control target key end

     0   :  { %vm38_vm0 = vcmask 261120   ;;  %s1163_s0 = inlined_call_operand.vmem [shape: f32[36,32], index: 0, kind: input, shape index: {}]   ;;  %s1164_s1 = inlined_call_operand.vmem [shape: f32[5,32,96], index: 1, kind: input, shape index: {}]   ;;  %s1165_s2 = inlined_call_operand.vmem [shape: f32[1,96], index: 2, kind: input, shape index: {}]   ;;  %s1166_s3 = inlined_call_operand.vmem [shape: f32[96,2], index: 3, kind: input, shape index: {}]   ;;  %s1167_s4 = inlined_call_operand.vmem [shape: f32[1,2], index: 4, kind: input, shape index: {}]   ;;  %s1168_s5 = inlined_call_operand.hbm [shape: f32[2,2], index: 5, kind: output, shape index: {}]  }
   0x1   :  { %v723_v0 = vld [vmem:[%s1164_s1 + $0x38] sm:$0xff]  ;;  %v722_v1 = vld [vmem:[%s1164_s1 + $0x30] sm:$0xff]  ;;  %v29_v2 = vld [vmem:[%s1163_s0 + $0x1] sm:$0xff] }
   0x2   :  { %812 = vmatprep.subr.mxu0 %v723_v0  ;;  %v721_v3 = vld [vmem:[%s1164_s1 + $0x28] sm:$0xff]  ;;  %820 = vmatprep.mubr.msk.f32.mxu0 %vm38_vm0, %v29_v2  ;;  %v720_v4 = vld [vmem:[%s1164_s1 + $0x20] sm:$0xff]  ;;  %v743_v5 = vld [vmem:[%s1164_s1 + $0x78] sm:$0xff] }
   0x3   :  { %813 = vmatpush3.msra.mxu0 %v723_v0  ;;  %v30_v6 = vld [vmem:[%s1163_s0 + $0x9] sm:$0xff]  ;;  %v28_v7 = vld [vmem:[%s1164_s1 + $0x18] sm:$0xff]  ;;  %854 = vmatprep.subr.mxu1 %v743_v5  ;;  %v21_v14 = vld [vmem:[%s1163_s0] sm:$0xff] }
   0x4   :  { %814 = vmatprep.subr.mxu0 %v722_v1  ;;  %v742_v8 = vld [vmem:[%s1164_s1 + $0x70] sm:$0xff]  ;;  %855 = vmatpush3.msra.mxu1 %v743_v5  ;;  %v741_v11 = vld [vmem:[%s1164_s1 + $0x68] sm:$0xff]  ;;  %v32_v12 = vld [vmem:[%s1163_s0 + $0x19] sm:$0xff] }
   0x5   :  { %815 = vmatpush3.msra.mxu0 %v722_v1  ;;  %v31_v9 = vld [vmem:[%s1163_s0 + $0x11] sm:$0xff]  ;;  %856 = vmatprep.subr.mxu1 %v742_v8  ;;  %v26_v13 = vld [vmem:[%s1164_s1 + $0x8] sm:$0xff]  ;;  %v25_v15 = vld [vmem:[%s1164_s1] sm:$0xff] }
   0x6   :  { %816 = vmatprep.subr.mxu0 %v721_v3  ;;  %v27_v10 = vld [vmem:[%s1164_s1 + $0x10] sm:$0xff]  ;;  %857 = vmatpush3.msra.mxu1 %v742_v8  ;;  %v740_v16 = vld [vmem:[%s1164_s1 + $0x60] sm:$0xff] }
   0x7   :  { %817 = vmatpush3.msra.mxu0 %v721_v3  ;;  %858 = vmatprep.subr.mxu1 %v741_v11 }
   0x8   :  { %818 = vmatprep.subr.mxu0 %v720_v4 }
   0x9   :  { %819 = vmatpush3.msra.mxu0 %v720_v4 }
   0xa   :  { %821 = vmatmul.mubr.msk.f32.vlgmr.msra.gmra.mxu0 %vm38_vm0, %v30_v6  ;;  %826 = vmatprep.subr.mxu0 %v28_v7 }
   0xb   :  { %827 = vmatpush3.msra.mxu0 %v28_v7  ;;  %823 = vmatprep.mubr.msk.f32.mxu0 %vm38_vm0, %v31_v9 }
   0xc   :  { %828 = vmatprep.subr.mxu0 %v27_v10 }
   0xd   :  { %829 = vmatpush3.msra.mxu0 %v27_v10 }
   0xe   :  { %824 = vmatmul.mubr.msk.f32.gmra.mxu0 %vm38_vm0, %v32_v12  ;;  %830 = vmatprep.subr.mxu0 %v26_v13 }
   0xf   :  { %10 = vsyncpa [#allocation3], 0  ;;  %831 = vmatpush3.msra.mxu0 %v26_v13  ;;  %834 = vmatprep.mubr.msk.f32.mxu0 %vm38_vm0, %v21_v14  ;;  %v22_v17 = vld [vmem:[%s1163_s0 + $0x8] sm:$0xff]  ;;  %v735_v18 = vld [vmem:[%s1164_s1 + $0x58] sm:$0xff]  ;;  %v935_v40 = vmov 0.0   ;;  %vm936_vm1 = vmmov 0   ;;  %v563_v56 = vlaneseq }
  0x10   :  { %832 = vmatprep.subr.mxu0 %v25_v15  ;;  %v23_v19 = vld [vmem:[%s1163_s0 + $0x10] sm:$0xff]  ;;  %859 = vmatpush3.msra.mxu1 %v741_v11  ;;  %v343_v21 = vld [vmem:[%s1163_s0 + $0x3] sm:$0xff]  ;;  %v24_v22 = vld [vmem:[%s1163_s0 + $0x18] sm:$0xff]  ;;  %v937_v5 = vmov 13   ;;  %vm580_vm10 = vcmask 785408   ;;  %vm601_vm11 = vcmask 1040384  }
  0x11   :  { %833 = vmatpush3.msra.mxu0 %v25_v15  ;;  %v734_v20 = vld [vmem:[%s1164_s1 + $0x50] sm:$0xff]  ;;  %860 = vmatprep.subr.mxu1 %v740_v16  ;;  %v733_v23 = vld [vmem:[%s1164_s1 + $0x48] sm:$0xff]  ;;  %v732_v25 = vld [vmem:[%s1164_s1 + $0x40] sm:$0xff]  ;;  %v567_v59 = vand.u32 127, %v563_v56  ;;  %v564_v1 = vshrl.u32 %v563_v56, 7  ;;  %s938_s22 = smov [#allocation2]  }
  0x12   :  { %835 = vmatmul.mubr.msk.f32.vlgmr.msra.gmra.mxu0 %vm38_vm0, %v22_v17  ;;  %840 = vmatprep.subr.mxu0 %v735_v18  ;;  %v233_v24 = vld [vmem:[%s1163_s0 + $0x2] sm:$0xff]  ;;  %v344_v26 = vld [vmem:[%s1163_s0 + $0xb] sm:$0xff]  ;;  %v345_v27 = vld [vmem:[%s1163_s0 + $0x13] sm:$0xff]  ;;  %s712_s23 = sshll.u32 %s938_s22, 4  ;;  %vm704_vm12 = vcmask 9216   ;;  %s713_s23 = int_to_ptr.vmem [resolvable:$true] %s712_s23 }
  0x13   :  { %841 = vmatpush3.msra.mxu0 %v735_v18  ;;  %837 = vmatprep.mubr.msk.f32.mxu0 %vm38_vm0, %v23_v19  ;;  %v234_v28 = vld [vmem:[%s1163_s0 + $0xa] sm:$0xff]  ;;  %v751_v29 = vld [vmem:[%s1164_s1 + $0x98] sm:$0xff]  ;;  %v748_v36 = vld [vmem:[%s1164_s1 + $0x80] sm:$0xff]  ;;  %vm568_vm2 = vcmp.ge.s32.totalorder %v567_v59, 32  ;;  %vm569_vm3 = vcmp.lt.s32.totalorder %v567_v59, 64  ;;  %vm572_vm5 = vcmp.ge.s32.totalorder %v567_v59, 64  ;;  %p918_p1 = scmp.lt.s32.totalorder %s713_s23, %s713_s23 }
  0x14   :  { %842 = vmatprep.subr.mxu0 %v734_v20  ;;  %861 = vmatpush3.msra.mxu1 %v740_v16  ;;  %v235_v30 = vld [vmem:[%s1163_s0 + $0x12] sm:$0xff]  ;;  %v346_v32 = vld [vmem:[%s1163_s0 + $0x1b] sm:$0xff]  ;;  %v749_v34 = vld [vmem:[%s1164_s1 + $0x88] sm:$0xff]  ;;  %vm573_vm6 = vcmp.lt.s32.totalorder %v567_v59, 96  ;;  %v565_v10 = vadd.s32 8, %v564_v1  ;;  %s913_s24 = scalar_lea.vmem %s713_s23, 32 }
  0x15   :  { %843 = vmatpush3.msra.mxu0 %v734_v20  ;;  %862 = vmatprep.mubr.msk.f32.mxu1 %vm38_vm0, %v343_v21  ;;  %v750_v31 = vld [vmem:[%s1164_s1 + $0x90] sm:$0xff]  ;;  %v236_v33 = vld [vmem:[%s1163_s0 + $0x1a] sm:$0xff]  ;;  %v453_v35 = vld [vmem:[%s1163_s0 + $0x4] sm:$0xff]  ;;  %p914_p0 = scmp.ne.s32.totalorder %s713_s23, %s913_s24  ;;  %p919_p2 = scmp.lt.s32.totalorder %s913_s24, %s913_s24 }
  0x16   :  { %838 = vmatmul.mubr.msk.f32.gmra.mxu0 %vm38_vm0, %v24_v22  ;;  %844 = vmatprep.subr.mxu0 %v733_v23  ;;  %v454_v37 = vld [vmem:[%s1163_s0 + $0xc] sm:$0xff]  ;;  %v455_v38 = vld [vmem:[%s1163_s0 + $0x14] sm:$0xff]  ;;  %v456_v39 = vld [vmem:[%s1163_s0 + $0x1c] sm:$0xff] }
  0x17   :  { %845 = vmatpush3.msra.mxu0 %v733_v23  ;;  %848 = vmatprep.mubr.msk.f32.mxu0 %vm38_vm0, %v233_v24  ;;  %v623_v41 = vld [vmem:[%s1166_s3 + $0x58] sm:$0xff]  ;;  %v622_v42 = vld [vmem:[%s1166_s3 + $0x50] sm:$0xff]  ;;  %v621_v43 = vld [vmem:[%s1166_s3 + $0x48] sm:$0xff]  ;;  %p920_p3 = por %p919_p2, %p918_p1 }
  0x18   :  { %846 = vmatprep.subr.mxu0 %v732_v25  ;;  %863 = vmatmul.mubr.msk.f32.vlgmr.msra.gmra.mxu1 %vm38_vm0, %v344_v26  ;;  %v620_v44 = vld [vmem:[%s1166_s3 + $0x40] sm:$0xff]  ;;  %v619_v45 = vld [vmem:[%s1166_s3 + $0x38] sm:$0xff]  ;;  %v618_v46 = vld [vmem:[%s1166_s3 + $0x30] sm:$0xff] }
  0x19   :  { %847 = vmatpush3.msra.mxu0 %v732_v25  ;;  %865 = vmatprep.mubr.msk.f32.mxu1 %vm38_vm0, %v345_v27  ;;  %v617_v47 = vld [vmem:[%s1166_s3 + $0x28] sm:$0xff]  ;;  %v616_v48 = vld [vmem:[%s1166_s3 + $0x20] sm:$0xff]  ;;  %v615_v49 = vld [vmem:[%s1166_s3 + $0x18] sm:$0xff]  ;;  %p921_p4 = pnand %p920_p3, %p914_p0 }
  0x1a   :  { %849 = vmatmul.mubr.msk.f32.vlgmr.msra.gmra.mxu0 %vm38_vm0, %v234_v28  ;;  %868 = vmatprep.subr.mxu0 %v751_v29  ;;  %v614_v50 = vld [vmem:[%s1166_s3 + $0x10] sm:$0xff]  ;;  %v613_v51 = vld [vmem:[%s1166_s3 + $0x8] sm:$0xff]  ;;  %v612_v52 = vld [vmem:[%s1166_s3] sm:$0xff] }
  0x1b   :  { %869 = vmatpush3.msra.mxu0 %v751_v29  ;;  %851 = vmatprep.mubr.msk.f32.mxu0 %vm38_vm0, %v235_v30  ;;  %vm570_vm4 = vmand %vm568_vm2, %vm569_vm3 }
  0x1c   :  { %870 = vmatprep.subr.mxu0 %v750_v31  ;;  %866 = vmatmul.mubr.msk.f32.gmra.mxu1 %vm38_vm0, %v346_v32  ;;  %v571_v6 = vsel %vm570_vm4, 12, %v937_v5  ;;  %vm574_vm7 = vmand %vm572_vm5, %vm573_vm6 }
  0x1d   :  { %871 = vmatpush3.msra.mxu0 %v750_v31  ;;  %882 = vmatprep.subr.mxu1 %v935_v40  ;;  %v575_v13 = vsel %vm574_vm7, 11, %v571_v6 }
  0x1e   :  { %852 = vmatmul.mubr.msk.f32.gmra.mxu0 %vm38_vm0, %v236_v33  ;;  %872 = vmatprep.subr.mxu0 %v749_v34  ;;  %vm577_vm8 = vcmp.le.s32.totalorder %v565_v10, %v575_v13  ;;  %vm576_vm9 = vcmp.le.s32.totalorder %v564_v1, %v575_v13 }
  0x1f   :  { %873 = vmatpush3.msra.mxu0 %v749_v34  ;;  %876 = vmatprep.mubr.msk.f32.mxu0 %vm38_vm0, %v453_v35 }
  0x20   :  { %874 = vmatprep.subr.mxu0 %v748_v36  ;;  %883 = vmatpush3.msra.mxu1 %v623_v41 }
  0x21   :  { %875 = vmatpush3.msra.mxu0 %v748_v36  ;;  %884 = vmatprep.subr.mxu1 %v935_v40 }
  0x22   :  { %877 = vmatmul.mubr.msk.f32.vlgmr.msra.gmra.mxu0 %vm38_vm0, %v454_v37  ;;  %885 = vmatpush3.msra.mxu1 %v622_v42 }
  0x23   :  { %879 = vmatprep.mubr.msk.f32.mxu0 %vm38_vm0, %v455_v38  ;;  %886 = vmatprep.subr.mxu1 %v935_v40 }
  0x24   :  { %887 = vmatpush3.msra.mxu1 %v621_v43  ;;  %906 = vmatprep.mubr.msk.f32.mxu1 %vm936_vm1, %v935_v40 }
  0x25   :  { %888 = vmatprep.subr.mxu1 %v935_v40 }
  0x26   :  { %880 = vmatmul.mubr.msk.f32.gmra.mxu0 %vm38_vm0, %v456_v39  ;;  %889 = vmatpush3.msra.mxu1 %v620_v44 }
  0x27   :  { %890 = vmatprep.subr.mxu1 %v935_v40 }
  0x28   :  { %891 = vmatpush3.msra.mxu1 %v619_v45 }
  0x29   :  { %892 = vmatprep.subr.mxu1 %v935_v40 }
  0x2a   :  { %893 = vmatpush3.msra.mxu1 %v618_v46 }
  0x2b   :  { %894 = vmatprep.subr.mxu1 %v935_v40 }
  0x2c   :  { %895 = vmatpush3.msra.mxu1 %v617_v47 }
  0x2d   :  { %896 = vmatprep.subr.mxu1 %v935_v40 }
  0x2e   :  { %897 = vmatpush3.msra.mxu1 %v616_v48 }
  0x2f   :  { %898 = vmatprep.subr.mxu1 %v935_v40 }
  0x30   :  { %899 = vmatpush3.msra.mxu1 %v615_v49 }
  0x31   :  { %900 = vmatprep.subr.mxu1 %v935_v40 }
  0x32   :  { %901 = vmatpush3.msra.mxu1 %v614_v50 }
  0x33   :  { %902 = vmatprep.subr.mxu1 %v935_v40 }
  0x34   :  { %903 = vmatpush3.msra.mxu1 %v613_v51 }
  0x35   :  { %904 = vmatprep.subr.mxu1 %v935_v40 }
  0x36   :  { %905 = vmatpush3.msra.mxu1 %v612_v52 }
  0xca   :  { %v822_v53 = vpop.f32.mrf.mxu0 }
  0xcc   :  { %v117_v54 = vpop.f32.mrf.mxu0 }
  0xce   :  { %v825_v55 = vpop.f32.mrf.mxu0 }
  0xd0   :  { %v127_v57 = vpop.f32.mrf.mxu0 }
  0xd2   :  { %v836_v58 = vpop.f32.mrf.mxu0 }
  0xd3   :  { %v220_v2 = vadd.f32 %v836_v58, %v822_v53  ;;  %v757_v58 = vld [vmem:[%s1167_s4] ss:$0 sm:$0xff] }
  0xd4   :  { %v214_v60 = vpop.f32.mrf.mxu0 }
  0xd5   :  { %v215_v7 = vadd.f32 %v214_v60, %v117_v54  ;;  %v756_v54 = vld [vmem:[%s1165_s2] ss:$0 sm:$0xff] }
  0xd6   :  { %v839_v61 = vpop.f32.mrf.mxu0 }
  0xd7   :  { %v230_v11 = vadd.f32 %v839_v61, %v825_v55 }
  0xd8   :  { %v224_v62 = vpop.f32.mrf.mxu0  ;;  %v864_v63 = vpop.f32.mrf.mxu1 }
  0xd9   :  { %v225_v16 = vadd.f32 %v224_v62, %v127_v57 }
  0xda   :  { %v850_v0 = vpop.f32.mrf.mxu0  ;;  %v430_v4 = vpop.f32.mrf.mxu1 }
  0xdb   :  { %v340_v8 = vadd.f32 %v850_v0, %v220_v2 }
  0xdc   :  { %v320_v3 = vpop.f32.mrf.mxu0  ;;  %v867_v15 = vpop.f32.mrf.mxu1 }
  0xdd   :  { %v339_v12 = vadd.f32 %v320_v3, %v215_v7  ;;  %v450_v17 = vadd.f32 %v864_v63, %v340_v8 }
  0xde   :  { %v853_v9 = vpop.f32.mrf.mxu0  ;;  %v440_v23 = vpop.f32.mrf.mxu1 }
  0xdf   :  { %v342_v18 = vadd.f32 %v853_v9, %v230_v11  ;;  %v449_v20 = vadd.f32 %v430_v4, %v339_v12 }
  0xe0   :  { %v330_v14 = vpop.f32.mrf.mxu0 }
  0xe1   :  { %v341_v21 = vadd.f32 %v330_v14, %v225_v16  ;;  %v452_v25 = vadd.f32 %v867_v15, %v342_v18 }
  0xe2   :  { %v878_v19 = vpop.f32.mrf.mxu0 }
  0xe3   :  { %v560_v22 = vadd.f32 %v878_v19, %v450_v17  ;;  %v451_v29 = vadd.f32 %v440_v23, %v341_v21 }
  0xe4   :  { %v540_v24 = vpop.f32.mrf.mxu0 }
  0xe5   :  { %v579_v26 = vsel %vm577_vm8, %v560_v22, -inf  ;;  %v559_v27 = vadd.f32 %v540_v24, %v449_v20 }
  0xe6   :  { %v881_v28 = vpop.f32.mrf.mxu0  ;;  %v582_v32 = vsel %vm580_vm10, %v579_v26, -inf }
  0xe7   :  { %v578_v30 = vsel %vm576_vm9, %v559_v27, -inf  ;;  %v562_v31 = vadd.f32 %v881_v28, %v452_v25 }
  0xe8   :  { %v581_v33 = vsel %vm580_vm10, %v578_v30, -inf  ;;  %v550_v34 = vpop.f32.mrf.mxu0 }
  0xe9   :  { %v583_v35 = vmax.f32 %v581_v33, %v582_v32  ;;  %v591_v36 = vsel %vm577_vm8, %v562_v31, -inf  ;;  %v561_v37 = vadd.f32 %v550_v34, %v451_v29 }
  0xea   :  { %v593_v40 = vsel %vm580_vm10, %v591_v36, -inf }
  0xeb   :  { %v584_v38 = vrot.slane %v583_v35, 4  ;;  %v590_v39 = vsel %vm576_vm9, %v561_v37, -inf }
  0xec   :  { %v592_v41 = vsel %vm580_vm10, %v590_v39, -inf }
  0xed   :  { %v585_v42 = vmax.f32 %v583_v35, %v584_v38  ;;  %v594_v43 = vmax.f32 %v592_v41, %v593_v40 }
  0xef   :  { %v586_v44 = vrot.slane %v585_v42, 2  ;;  %v595_v45 = vrot.slane %v594_v43, 4 }
  0xf1   :  { %v587_v46 = vmax.f32 %v585_v42, %v586_v44  ;;  %v596_v47 = vmax.f32 %v594_v43, %v595_v45 }
  0xf3   :  { %v597_v48 = vrot.slane %v596_v47, 2  ;;  %v588_v49 = vrot.slane %v587_v46, 1 }
  0xf5   :  { %v598_v50 = vmax.f32 %v596_v47, %v597_v48  ;;  %v589_v52 = vmax.f32 %v587_v46, %v588_v49 }
  0xf7   :  { %v599_v51 = vrot.slane %v598_v50, 1 }
  0xf9   :  { %v600_v53 = vmax.f32 %v598_v50, %v599_v51 }
  0xfb   :  { %v602_v55 = vsel %vm601_vm11, %v589_v52, %v600_v53 }
  0xfc   :  { %v610_v56 = vadd.f32 %v756_v54, %v602_v55 }
  0xfe   :  { %v611_v57 = vmax.f32 %v610_v56, 0.0 }
 0x100   :  { %907 = vmatmul.mubr.msk.f32.vlgmr.msra.gmra.mxu1 %vm580_vm10, %v611_v57 }
 0x1c0   :  { %v700_v59 = vpop.f32.mrf.mxu1 }
 0x1c1   :  { %v701_v60 = vadd.f32 %v757_v58, %v700_v59 }
 0x1c2   :  { %v908_v61 = vpop.f32.mrf.mxu1 }
 0x1c3   :  { %705 = vst.msk [vmem:[#allocation2] sm:$0x3] %vm704_vm12, %v701_v60 }
 0x1c4   :  { %924 = shalt.err (!%p921_p4)
}
 0x1c5   :  { %715 = dma.vmem_to_hbm [thread:$0]  %s713_s23, 32, %s1168_s5, [#allocation3]  }
 0x1c6   :  { %933 = dma.done.wait [#allocation3], 32  }
 0x1c7   :  { %934 = vsyncadd [#allocation3], 4294967264 }
 0x1c8   :  { %719 = vsyncpa [#allocation3], 1 }

</bundles_post_ra>
